<compile_context>
chip_gen: v7x
topology: tpu7x:2x2x1
jax: 0.10.0
libtpu: 0.0.40
codegen_flags: <defaults>
</compile_context>

<pallas_src>
import jax
import jax.numpy as jnp
from jax.experimental import pallas as pl
from jax.experimental.pallas import tpu as pltpu


_TILE_CAP = 1024          # rows per batch tile; mem-bound => big tiles amortize step cost
_PALLAS_MIN_BATCH = 64    # below this, fused XLA is as fast or faster


def _round_up(n: int, m: int) -> int:
    return ((n + m - 1) // m) * m


def _choose_batch_tile(batch: int) -> int:
    """Pick a large, 8-aligned batch tile; aim for >= 2 grid steps (v7x 2-TC)."""
    if batch <= 16:
        return _round_up(batch, 8)
    return min(_TILE_CAP, _round_up(pl.cdiv(batch, 2), 8))


def _prior_forward_kernel(series_ref, w_t_ref, b_ref, out_ref):
    # series_ref: (TB, L) f32   w_t_ref: (L, P) f32   b_ref: (1, P) f32
    # out_ref:    (2, TB, P) f32  -- [0] = logits, [1] = log_softmax(logits)
    logits = jnp.dot(series_ref[...], w_t_ref[...],
                     preferred_element_type=jnp.float32) + b_ref[...]

    # Numerically stable log-softmax along the programs axis (dim=1 of a 2D input).
    m = jnp.max(logits, axis=-1, keepdims=True)           # (TB, 1)
    z = logits - m
    lse = jnp.log(jnp.sum(jnp.exp(z), axis=-1, keepdims=True))

    out_ref[0, ...] = logits
    out_ref[1, ...] = z - lse


def prior_model_forward(series: jax.Array,
                        weight: jax.Array,
                        bias: jax.Array,
                        *,
                        batch_tile: int | None = None,
                        use_pallas: bool | None = None):
    """Pallas implementation of PriorModel.forward.

    Args:
      series: (B, series_length) float32
      weight: (num_programs, series_length) float32 (torch Linear .weight layout)
      bias:   (num_programs,) float32
      batch_tile: optional override for the batch tile size (rounded up to 8).
      use_pallas: force (True) / skip (False) the Pallas kernel; None = auto
        (pure-XLA fusion below _PALLAS_MIN_BATCH rows).
    Returns:
      (logits, dist_programs): both (B, num_programs) float32
    """
    series = series.astype(jnp.float32)
    B, L = series.shape
    P, L2 = weight.shape
    assert L == L2, "weight shape does not match series_length"

    w_t = jnp.transpose(weight).astype(jnp.float32)        # (L, P)
    b2d = bias.astype(jnp.float32).reshape(1, P)            # (1, P)

    if use_pallas is None:
        use_pallas = B >= _PALLAS_MIN_BATCH
    if not use_pallas:
        # Tiny-batch path: let XLA fuse Linear + log_softmax (launch/step
        # overhead would dominate a single-tile Pallas call).
        logits = series @ w_t + b2d
        return logits, jax.nn.log_softmax(logits, axis=-1)

    # --- tile / grid selection ---------------------------------------------
    if batch_tile is None:
        batch_tile = _choose_batch_tile(B)
    batch_tile = _round_up(max(batch_tile, 8), 8)

    num_steps = pl.cdiv(B, batch_tile)
    padded_b = num_steps * batch_tile
    series_p = series
    if padded_b != B:
        # Zero-pad the batch; padded rows yield log_softmax(bias) (finite) and
        # are sliced off below, so they never pollute real outputs.
        series_p = jnp.pad(series, ((0, padded_b - B), (0, 0)))

    out = pl.pallas_call(
        _prior_forward_kernel,
        out_shape=jax.ShapeDtypeStruct((2, padded_b, P), jnp.float32),
        grid_spec=pltpu.PrefetchScalarGridSpec(
            num_scalar_prefetch=0,
            grid=(num_steps,),
            in_specs=[
                # series: tile over batch, full series_length on lanes
                pl.BlockSpec((batch_tile, L), lambda i: (i, 0)),
                # transposed weight: resident across grid iterations
                pl.BlockSpec((L, P), lambda i: (0, 0)),
                # bias: resident
                pl.BlockSpec((1, P), lambda i: (0, 0)),
            ],
            # Single fused output block per step: [0]=logits, [1]=log_softmax.
            out_specs=pl.BlockSpec((2, batch_tile, P), lambda i: (0, i, 0)),
        ),
        compiler_params=pltpu.CompilerParams(
            dimension_semantics=("parallel",),
            # Working set per step is < 1 MiB even at the 1024-row cap, so
            # 32 MiB is safe on all of v5e / v6e / v7x (64 MiB physical).
            vmem_limit_bytes=32 * 1024 * 1024,
        ),
    )(series_p, w_t, b2d)

    logits = out[0, :B]
    dist_programs = out[1, :B]
    return logits, dist_programs


def _reference_forward(series, weight, bias):
    logits = series.astype(jnp.float32) @ weight.T + bias
    return logits, jax.nn.log_softmax(logits, axis=1)


if __name__ == "__main__":
    key = jax.random.PRNGKey(0)
    k_w, k_b, k_x, k_x2 = jax.random.split(key, 4)

    # Small shapes consistent with the module's forward.
    series_length = 16
    num_programs = 12
    batch = 8
    # embedding_dim=10 default is only used by sample(), not forward().

    weight = jax.random.normal(
        k_w, (num_programs, series_length), dtype=jnp.float32) * 0.1
    bias = jax.random.normal(k_b, (num_programs,), dtype=jnp.float32) * 0.1
    series = jax.random.normal(k_x, (batch, series_length), dtype=jnp.float32)

    # 1) Tiny demo batch — force the Pallas path so the kernel is exercised.
    logits, dist_programs = prior_model_forward(series, weight, bias,
                                                use_pallas=True)
    logits = jax.block_until_ready(logits)
    dist_programs = jax.block_until_ready(dist_programs)

    ref_logits, ref_logp = _reference_forward(series, weight, bias)
    assert logits.shape == (batch, num_programs)
    assert dist_programs.shape == (batch, num_programs)
    assert jnp.allclose(logits, ref_logits, atol=1e-5, rtol=1e-5), "logits mismatch"
    assert jnp.allclose(dist_programs, ref_logp, atol=1e-5, rtol=1e-5), "log_softmax mismatch"

    # 2) Non-divisible batch — exercises cdiv + padding and a >= 2-step grid
    #    (so both v7x TensorCores get work).
    batch2 = 300
    series2 = jax.random.normal(k_x2, (batch2, series_length), dtype=jnp.float32)
    logits2, logp2 = prior_model_forward(series2, weight, bias)
    logits2 = jax.block_until_ready(logits2)
    logp2 = jax.block_until_ready(logp2)

    ref_logits2, ref_logp2 = _reference_forward(series2, weight, bias)
    assert logits2.shape == (batch2, num_programs)
    assert logp2.shape == (batch2, num_programs)
    assert jnp.allclose(logits2, ref_logits2, atol=1e-5, rtol=1e-5), "logits mismatch (B=300)"
    assert jnp.allclose(logp2, ref_logp2, atol=1e-5, rtol=1e-5), "log_softmax mismatch (B=300)"

    # TODO(synk): PriorModel.sample (Categorical sampling / log_prob) and
    # get_layer_wise (host-side numpy index math) are not part of forward and
    # are intentionally not implemented as Pallas kernels.

    print("KERNEL_OK")
</pallas_src>

<mosaic_0001>
module attributes {stable_mosaic.version = 11 : i64} {
  func.func @_prior_forward_kernel(%arg0: i32, %arg1: memref<8x16xf32, #tpu.memory_space<vmem>>, %arg2: memref<16x12xf32, #tpu.memory_space<vmem>>, %arg3: memref<1x12xf32, #tpu.memory_space<vmem>>, %arg4: memref<2x8x12xf32, #tpu.memory_space<vmem>>) attributes {dimension_semantics = [#tpu.dimension_semantics<parallel>], iteration_bounds = array<i64: 1>, scalar_prefetch = 0 : i64, scratch_operands = 0 : i64, tpu.core_type = #tpu.core_type<tc>, window_params = [{transform_indices = @transform_0, window_bounds = array<i64: 8, 16>}, {pipeline_mode = #tpu.pipeline_mode<synchronous>, transform_indices = @transform_1, window_bounds = array<i64: 16, 12>}, {pipeline_mode = #tpu.pipeline_mode<synchronous>, transform_indices = @transform_2, window_bounds = array<i64: 1, 12>}, {transform_indices = @transform_3, window_bounds = array<i64: 2, 8, 12>}]} {
    %c0 = arith.constant 0 : index
    %c0_0 = arith.constant 0 : index
    %0 = vector.load %arg1[%c0, %c0_0] : memref<8x16xf32, #tpu.memory_space<vmem>>, vector<8x16xf32>
    %c0_1 = arith.constant 0 : index
    %c0_2 = arith.constant 0 : index
    %1 = vector.load %arg2[%c0_1, %c0_2] : memref<16x12xf32, #tpu.memory_space<vmem>>, vector<16x12xf32>
    %cst = arith.constant dense<0.000000e+00> : vector<8x12xf32>
    %2 = tpu.matmul %0, %1, %cst {dimension_numbers = #tpu.dot_dimension_numbers<[1], [0], [0], [1], [0, 0, 1, 1], [], []>} : vector<8x16xf32>, vector<16x12xf32>, vector<8x12xf32> -> vector<8x12xf32>
    %c0_3 = arith.constant 0 : index
    %c0_4 = arith.constant 0 : index
    %3 = vector.load %arg3[%c0_3, %c0_4] : memref<1x12xf32, #tpu.memory_space<vmem>>, vector<1x12xf32>
    %4 = vector.broadcast %3 : vector<1x12xf32> to vector<8x12xf32>
    %5 = arith.addf %2, %4 : vector<8x12xf32>
    %cst_5 = arith.constant dense<0xFF800000> : vector<8xf32>
    %6 = vector.multi_reduction <maximumf>, %5, %cst_5 [1] : vector<8x12xf32> to vector<8xf32>
    %7 = vector.shape_cast %6 : vector<8xf32> to vector<8x1xf32>
    %8 = vector.broadcast %7 : vector<8x1xf32> to vector<8x12xf32>
    %9 = arith.subf %5, %8 : vector<8x12xf32>
    %10 = math.exp %9 : vector<8x12xf32>
    %cst_6 = arith.constant dense<0.000000e+00> : vector<8xf32>
    %11 = vector.multi_reduction <add>, %10, %cst_6 [1] : vector<8x12xf32> to vector<8xf32>
    %12 = vector.shape_cast %11 : vector<8xf32> to vector<8x1xf32>
    %13 = math.log %12 : vector<8x1xf32>
    %c0_7 = arith.constant 0 : index
    %c0_8 = arith.constant 0 : index
    %c0_9 = arith.constant 0 : index
    %14 = vector.load %arg4[%c0_7, %c0_8, %c0_9] : memref<2x8x12xf32, #tpu.memory_space<vmem>>, vector<1x8x12xf32>
    %15 = vector.shape_cast %14 : vector<1x8x12xf32> to vector<8x12xf32>
    %16 = vector.shape_cast %5 : vector<8x12xf32> to vector<1x8x12xf32>
    tpu.vector_store %arg4[%c0_7, %c0_8, %c0_9], %16 {strides = array<i32>} : memref<2x8x12xf32, #tpu.memory_space<vmem>>, vector<1x8x12xf32>,
    %17 = vector.broadcast %13 : vector<8x1xf32> to vector<8x12xf32>
    %18 = arith.subf %9, %17 : vector<8x12xf32>
    %c1 = arith.constant 1 : index
    %c0_10 = arith.constant 0 : index
    %c0_11 = arith.constant 0 : index
    %19 = vector.load %arg4[%c1, %c0_10, %c0_11] : memref<2x8x12xf32, #tpu.memory_space<vmem>>, vector<1x8x12xf32>
    %20 = vector.shape_cast %19 : vector<1x8x12xf32> to vector<8x12xf32>
    %21 = vector.shape_cast %18 : vector<8x12xf32> to vector<1x8x12xf32>
    tpu.vector_store %arg4[%c1, %c0_10, %c0_11], %21 {strides = array<i32>} : memref<2x8x12xf32, #tpu.memory_space<vmem>>, vector<1x8x12xf32>,
    return
  }
  func.func @transform_0(%arg0: i32) -> (i32, i32) {
    %c0_i32 = arith.constant 0 : i32
    %c0_i32_0 = arith.constant 0 : i32
    return %arg0, %c0_i32 : i32, i32
  }
  func.func @transform_1(%arg0: i32) -> (i32, i32) {
    %c0_i32 = arith.constant 0 : i32
    %c0_i32_0 = arith.constant 0 : i32
    %c0_i32_1 = arith.constant 0 : i32
    return %c0_i32, %c0_i32_0 : i32, i32
  }
  func.func @transform_2(%arg0: i32) -> (i32, i32) {
    %c0_i32 = arith.constant 0 : i32
    %c0_i32_0 = arith.constant 0 : i32
    %c0_i32_1 = arith.constant 0 : i32
    return %c0_i32, %c0_i32_0 : i32, i32
  }
  func.func @transform_3(%arg0: i32) -> (i32, i32, i32) {
    %c0_i32 = arith.constant 0 : i32
    %c0_i32_0 = arith.constant 0 : i32
    %c0_i32_1 = arith.constant 0 : i32
    return %c0_i32, %arg0, %c0_i32_0 : i32, i32, i32
  }
}

</mosaic_0001>

<bundles_post_ra>
// kernel: tpu_custom_call.1
= control target key start
LH: loop header
LB: loop body
LE: loop exit
PB: predicated region body
PF: predicated region fallthrough
CT: control target
= control target key end

     0   :  { %8 = vsyncpa [#allocation3], 0  ;;  %s342_s0 = inlined_call_operand.hbm [shape: f32[8,16], index: 0, kind: input, shape index: {}]   ;;  %s343_s1 = inlined_call_operand.hbm [shape: f32[16,12], index: 1, kind: input, shape index: {}]   ;;  %s344_s2 = inlined_call_operand.vmem [shape: f32[1,12], index: 2, kind: input, shape index: {}]   ;;  %s345_s3 = inlined_call_operand.hbm [shape: f32[2,8,12], index: 3, kind: output, shape index: {}]  }
   0x1   :  { %9 = vsyncpa [#allocation6], 0 }
   0x2   :  { %10 = vsyncpa [#allocation4], 0  ;;  %s258_s12 = smov [#allocation2]   ;;  %s259_s14 = smov [#allocation5]  }
   0x3   :  { %s17_s13 = sshll.u32 %s258_s12, 4  ;;  %s26_s15 = sshll.u32 %s259_s14, 4  ;;  %s18_s13 = int_to_ptr.vmem [resolvable:$true] %s17_s13  ;;  %s286_s15 = int_to_ptr.vmem [resolvable:$true] %s26_s15 }
   0x4   :  { %s186_s18 = scalar_lea.hbm %s342_s0, 128 }
   0x5   :  { %p187_p0 = scmp.ne.s32.totalorder %s342_s0, %s186_s18  ;;  %p190_p1 = scmp.lt.u32.totalorder %s186_s18, %s342_s0 }
   0x7   :  { %p192_p2 = pnand %p190_p1, %p187_p0 }
   0x9   :  { %195 = shalt.err (!%p192_p2)
}
   0xa   :  { %s196_s23 = scalar_lea.vmem %s18_s13, 128  ;;  %p201_p4 = scmp.lt.s32.totalorder %s18_s13, %s18_s13 }
   0xb   :  { %p197_p3 = scmp.ne.s32.totalorder %s18_s13, %s196_s23  ;;  %p202_p5 = scmp.lt.s32.totalorder %s196_s23, %s196_s23 }
   0xd   :  { %p203_p6 = por %p202_p5, %p201_p4 }
   0xf   :  { %p204_p7 = pnand %p203_p6, %p197_p3 }
  0x11   :  { %207 = shalt.err (!%p204_p7)
}
  0x12   :  { %20 = dma.hbm_to_vmem [thread:$0]  %s342_s0, 128, %s18_s13, [#allocation3]  }
  0x13   :  { %s208_s28 = scalar_lea.hbm %s343_s1, 256 }
  0x14   :  { %p209_p8 = scmp.ne.s32.totalorder %s343_s1, %s208_s28  ;;  %p212_p9 = scmp.lt.u32.totalorder %s208_s28, %s343_s1 }
  0x16   :  { %p214_p10 = pnand %p212_p9, %p209_p8 }
  0x18   :  { %217 = shalt.err (!%p214_p10)
}
  0x19   :  { %s218_s6 = scalar_lea.vmem %s286_s15, 256  ;;  %p223_p12 = scmp.lt.s32.totalorder %s286_s15, %s286_s15 }
  0x1a   :  { %p219_p11 = scmp.ne.s32.totalorder %s286_s15, %s218_s6  ;;  %p224_p13 = scmp.lt.s32.totalorder %s218_s6, %s218_s6 }
  0x1c   :  { %p225_p0 = por %p224_p13, %p223_p12 }
  0x1e   :  { %p226_p1 = pnand %p225_p0, %p219_p11 }
  0x20   :  { %229 = shalt.err (!%p226_p1)
}
  0x21   :  { %s260_s0 = smov 128   ;;  %s261_s7 = smov 8  }
  0x22   :  { %32 = dma.hbm_to_vmem [thread:$0]  %s343_s1, 256, %s286_s15, [#allocation6], %s260_s0, %s260_s0, %s261_s7  }
  0x23   :  { %252 = dma.done.wait [#allocation3], 128  }
  0x24   :  { %253 = vsyncadd [#allocation3], 4294967168 }
  0x25   :  { %254 = dma.done.wait [#allocation6], 256  }
  0x26   :  { %255 = vsyncadd [#allocation6], 4294967040  ;;  %v262_v0 = vmov 0.0|0.0   ;;  %vm263_vm0 = vmmov 0   ;;  %v264_v1 = vmov 0.0   ;;  %v42_v2 = vld [vmem:[#allocation5] sm:$0xff] }
  0x27   :  { %171 = vmatprep.subr.bf16.mxu0 %v262_v0  ;;  %168 = vmatprep.mubr.msk.f32.mxu0 %vm263_vm0, %v264_v1  ;;  %v43_v3 = vld [vmem:[#allocation5 + $0x8] sm:$0xff]  ;;  %v41_v5 = vld [vmem:[#allocation2] sm:$0xff]  ;;  %vm51_vm1 = vcmask 130048   ;;  %vm125_vm2 = vcmask 97280   ;;  %s265_s1 = smov [#allocation7]  }
  0x28   :  { %v172_v4 = vpack.c.bf16 %v43_v3, %v42_v2  ;;  %v159_v6 = vld [vmem:[%s344_s2] ss:$0 sm:$0xff]  ;;  %s146_s2 = sshll.u32 %s265_s1, 4  ;;  %s147_s2 = int_to_ptr.vmem [resolvable:$true] %s146_s2 }
  0x29   :  { %s230_s12 = scalar_lea.vmem %s147_s2, 256  ;;  %p235_p3 = scmp.lt.s32.totalorder %s147_s2, %s147_s2 }
  0x2a   :  { %173 = vmatpush3.bf16.msra.mxu0 %v172_v4  ;;  %p231_p2 = scmp.ne.s32.totalorder %s147_s2, %s230_s12  ;;  %p236_p4 = scmp.lt.s32.totalorder %s230_s12, %s230_s12 }
  0x2c   :  { %p237_p5 = por %p236_p4, %p235_p3 }
  0x2d   :  { %169 = vmatmul.mubr.msk.f32.vlgmr.msra.gmra.mrb[0].mxu0 %vm51_vm1, %v41_v5 }
  0x2e   :  { %p238_p6 = pnand %p237_p5, %p231_p2 }
 0x100   :  { %v121_v7 = vpop.f32.mrb[0].mxu0 }
 0x101   :  { %v122_v8 = vadd.f32 %v159_v6, %v121_v7  ;;  %v170_v9 = vpop.f32.mrb[1].mxu0 }
 0x103   :  { %v126_v10 = vsel %vm125_vm2, %v122_v8, -inf  ;;  %137 = vst.msk [vmem:[#allocation7] sm:$0xff] %vm125_vm2, %v122_v8 }
 0x104   :  { %127 = vmax.xlane.f32.xlu0 %v126_v10 }
 0x191   :  { %v128_v11 = vpop.xlane.xlu0 %127 }
 0x192   :  { %v129_v12 = vsub.f32 %v122_v8, %v128_v11 }
 0x194   :  { %v130_v13 = vmul.f32 1.442695, %v129_v12 }
 0x196   :  { %182 = vpow2.f32 %v130_v13 }
 0x1a0   :  { %v183_v14 = vpop.eup %182 }
 0x1a1   :  { %v132_v15 = vsel %vm125_vm2, %v183_v14, 0.0 }
 0x1a2   :  { %133 = vadd.xlane.f32.xlu0 %v132_v15 }
 0x22f   :  { %v134_v16 = vpop.xlane.xlu0 %133 }
 0x230   :  { %184 = vlog2.f32 %v134_v16 }
 0x23a   :  { %v185_v17 = vpop.eup %184 }
 0x23b   :  { %v136_v18 = vmul.f32 0.6931472, %v185_v17 }
 0x23d   :  { %v138_v19 = vsub.f32 %v129_v12, %v136_v18 }
 0x23f   :  { %140 = vst.msk [vmem:[#allocation7 + $0x8] sm:$0xff] %vm125_vm2, %v138_v19 }
 0x240   :  { %241 = shalt.err (!%p238_p6)
}
 0x241   :  { %s242_s15 = scalar_lea.hbm %s345_s3, 256 }
 0x242   :  { %p243_p7 = scmp.ne.s32.totalorder %s345_s3, %s242_s15  ;;  %p246_p8 = scmp.lt.u32.totalorder %s242_s15, %s345_s3 }
 0x244   :  { %p248_p9 = pnand %p246_p8, %p243_p7 }
 0x246   :  { %251 = shalt.err (!%p248_p9)
}
 0x247   :  { %152 = dma.vmem_to_hbm [thread:$0]  %s147_s2, 256, %s345_s3, [#allocation4], %s260_s0, %s260_s0, %s261_s7  }
 0x248   :  { %256 = dma.done.wait [#allocation4], 256  }
 0x249   :  { %257 = vsyncadd [#allocation4], 4294967040 }
 0x24a   :  { %156 = vsyncpa [#allocation3], 1 }
 0x24b   :  { %157 = vsyncpa [#allocation6], 1 }
 0x24c   :  { %158 = vsyncpa [#allocation4], 1 }

</bundles_post_ra>
